<compile_context>
chip_gen: v6e
topology: v6e:2x2x1
jax: 0.10.0
libtpu: 0.0.40
codegen_flags: <defaults>
</compile_context>

<pallas_src>
import math

import jax
import jax.numpy as jnp
from jax import lax
from jax.experimental import pallas as pl
from jax.experimental.pallas import tpu as pltpu

_LOG_2PI = math.log(2.0 * math.pi)


# -----------------------------------------------------------------------------
# Forward pass: concrete parameters of the prior distribution.
# TODO(synk): the td.MixtureSameFamily object itself (and .sample()) has no
# Pallas equivalent; we expose its parameters here and its log_prob kernel below.
# -----------------------------------------------------------------------------
def mog_prior_forward(mixture_weights, means, stds):
    probs = jax.nn.softmax(mixture_weights.astype(jnp.float32))
    scales = jnp.exp(stds.astype(jnp.float32))
    return probs, means.astype(jnp.float32), scales


# -----------------------------------------------------------------------------
# Pallas kernel: mixture log_prob for one tile of tB samples.
#   w_ref   : (K, 2D)  grid-invariant fused weights [-0.5*inv_var | mu*inv_var]
#   bias_ref: (K, 1)   grid-invariant per-component constant + log mix weight
#   zt_ref  : (D, tB)  tile of z^T (D on sublanes, batch on lanes)
#   out_ref : (1, tB)  lane-dense log p(z) row
# mix[k,b] = sum_d [ z^2 * (-0.5*ivar) + z * (mu*ivar) ] + bias_k
# log p(z_b) = logsumexp_k mix[k,b]
# -----------------------------------------------------------------------------
def _mog_logprob_kernel(w_ref, bias_ref, zt_ref, out_ref):
    zt = zt_ref[...]                                        # (D, tB)
    a = jnp.concatenate([zt * zt, zt], axis=0)              # (2D, tB)
    mix = lax.dot_general(
        w_ref[...], a, (((1,), (0,)), ((), ())),            # native (M,K)x(K,N)
        preferred_element_type=jnp.float32) + bias_ref[...]  # (K, tB)
    m = jnp.max(mix, axis=0, keepdims=True)                 # (1, tB)
    s = jnp.sum(jnp.exp(mix - m), axis=0, keepdims=True)    # (1, tB)
    out_ref[...] = m + jnp.log(s)


def mog_prior_log_prob(mixture_weights, means, stds, z, *, block_b=512):
    """Mixture-of-Gaussians prior log_prob(z); z: (B, D) -> (B,)."""
    w = mixture_weights.astype(jnp.float32)
    means = means.astype(jnp.float32)
    stds = stds.astype(jnp.float32)
    z = z.astype(jnp.float32)
    K, D = means.shape
    B = z.shape[0]

    # ---- z-independent precompute (hoisted out of the hot kernel) ----
    log_w = jax.nn.log_softmax(w)                           # (K,)
    inv_var = jnp.exp(-2.0 * stds)                          # overflow-safe 1/scale^2
    w_mat = jnp.concatenate([-0.5 * inv_var, means * inv_var], axis=1)  # (K, 2D)
    bias = (log_w
            - 0.5 * jnp.sum(means * means * inv_var, axis=1)
            - jnp.sum(stds, axis=1)                         # log-det = sum_d stds
            - 0.5 * D * _LOG_2PI).reshape(K, 1)             # (K, 1)

    # ---- lane-align & tile the batch (lane-dense layout plumbing) ----
    tB = int(min(block_b, pl.cdiv(B, 128) * 128))           # multiple of 128
    Bp = int(pl.cdiv(B, tB) * tB)
    z_pad = jnp.pad(z, ((0, Bp - B), (0, 0)))
    zt = z_pad.T                                            # (D, Bp)
    # NOTE: for very large HBM-bound B, cast zt / w_mat to bf16 here (keep
    # preferred_element_type=f32) to halve the z stream.

    out = pl.pallas_call(
        _mog_logprob_kernel,
        out_shape=jax.ShapeDtypeStruct((1, Bp), jnp.float32),
        grid_spec=pltpu.PrefetchScalarGridSpec(
            num_scalar_prefetch=0,
            grid=(Bp // tB,),
            in_specs=[
                pl.BlockSpec((K, 2 * D), lambda i: (0, 0)),   # grid-invariant
                pl.BlockSpec((K, 1), lambda i: (0, 0)),       # grid-invariant
                pl.BlockSpec((D, tB), lambda i: (0, i)),      # streamed z^T
            ],
            out_specs=pl.BlockSpec((1, tB), lambda i: (0, i)),
        ),
        compiler_params=pltpu.CompilerParams(
            dimension_semantics=("parallel",),               # shards B on v7x 2-TC
            vmem_limit_bytes=32 * 1024 * 1024,               # explicit (v5e default=16MiB)
        ),
    )(w_mat, bias, zt)
    return out.reshape(Bp)[:B]


# -----------------------------------------------------------------------------
# Pure-JAX reference (mirrors torch.distributions semantics)
# -----------------------------------------------------------------------------
def _ref_log_prob(w, means, stds, z):
    log_w = jax.nn.log_softmax(w)
    scale = jnp.exp(stds)
    diff = (z[:, None, :] - means[None, :, :]) / scale[None, :, :]
    comp = jnp.sum(-0.5 * diff * diff - stds[None, :, :]
                   - 0.5 * _LOG_2PI, axis=-1)               # (B, K)
    return jax.scipy.special.logsumexp(comp + log_w[None, :], axis=-1)


if __name__ == "__main__":
    K = 8     # num_components
    D = 32    # latent_dim
    B = 16    # latent samples to evaluate log_prob on

    key = jax.random.PRNGKey(0)
    k_w, k_mu, k_z = jax.random.split(key, 3)

    # __init__: randn(K), randn(K, D), ones(K, D)
    mixture_weights = jax.random.normal(k_w, (K,), dtype=jnp.float32)
    means = jax.random.normal(k_mu, (K, D), dtype=jnp.float32)
    stds = jnp.ones((K, D), dtype=jnp.float32)
    z = jax.random.normal(k_z, (B, D), dtype=jnp.float32)

    # Forward pass: distribution parameters (softmax / exp).
    probs, locs, scales = mog_prior_forward(mixture_weights, means, stds)

    # Hot path: mixture log_prob via the Pallas kernel.
    lp = mog_prior_log_prob(mixture_weights, means, stds, z)
    jax.block_until_ready((probs, locs, scales, lp))

    # Validate against pure-JAX reference of the torch.distributions math.
    assert jnp.allclose(probs, jax.nn.softmax(mixture_weights), atol=1e-5, rtol=1e-5)
    assert jnp.allclose(scales, jnp.exp(stds), atol=1e-5, rtol=1e-5)
    ref_lp = _ref_log_prob(mixture_weights, means, stds, z)
    assert jnp.allclose(lp, ref_lp, atol=1e-4, rtol=1e-4)

    print("KERNEL_OK")
</pallas_src>

<mosaic_0001>
module attributes {stable_mosaic.version = 11 : i64} {
  func.func @_mog_logprob_kernel(%arg0: i32, %arg1: memref<8x64xf32, #tpu.memory_space<vmem>>, %arg2: memref<8x1xf32, #tpu.memory_space<vmem>>, %arg3: memref<32x128xf32, #tpu.memory_space<vmem>>, %arg4: memref<1x128xf32, #tpu.memory_space<vmem>>) attributes {dimension_semantics = [#tpu.dimension_semantics<parallel>], iteration_bounds = array<i64: 1>, scalar_prefetch = 0 : i64, scratch_operands = 0 : i64, tpu.core_type = #tpu.core_type<tc>, window_params = [{pipeline_mode = #tpu.pipeline_mode<synchronous>, transform_indices = @transform_0, window_bounds = array<i64: 8, 64>}, {pipeline_mode = #tpu.pipeline_mode<synchronous>, transform_indices = @transform_1, window_bounds = array<i64: 8, 1>}, {transform_indices = @transform_2, window_bounds = array<i64: 32, 128>}, {transform_indices = @transform_3, window_bounds = array<i64: 1, 128>}]} {
    %c0 = arith.constant 0 : index
    %c0_0 = arith.constant 0 : index
    %0 = vector.load %arg3[%c0, %c0_0] : memref<32x128xf32, #tpu.memory_space<vmem>>, vector<32x128xf32>
    %1 = arith.mulf %0, %0 : vector<32x128xf32>
    %2 = tpu.concatenate %1, %0 in 0 : vector<32x128xf32>, vector<32x128xf32> -> vector<64x128xf32>
    %c0_1 = arith.constant 0 : index
    %c0_2 = arith.constant 0 : index
    %3 = vector.load %arg1[%c0_1, %c0_2] : memref<8x64xf32, #tpu.memory_space<vmem>>, vector<8x64xf32>
    %cst = arith.constant dense<0.000000e+00> : vector<8x128xf32>
    %4 = tpu.matmul %3, %2, %cst {dimension_numbers = #tpu.dot_dimension_numbers<[1], [0], [0], [1], [0, 0, 1, 1], [], []>} : vector<8x64xf32>, vector<64x128xf32>, vector<8x128xf32> -> vector<8x128xf32>
    %c0_3 = arith.constant 0 : index
    %c0_4 = arith.constant 0 : index
    %5 = vector.load %arg2[%c0_3, %c0_4] : memref<8x1xf32, #tpu.memory_space<vmem>>, vector<8x1xf32>
    %6 = vector.broadcast %5 : vector<8x1xf32> to vector<8x128xf32>
    %7 = arith.addf %4, %6 : vector<8x128xf32>
    %cst_5 = arith.constant dense<0xFF800000> : vector<128xf32>
    %8 = vector.multi_reduction <maximumf>, %7, %cst_5 [0] : vector<8x128xf32> to vector<128xf32>
    %9 = vector.shape_cast %8 : vector<128xf32> to vector<1x128xf32>
    %10 = vector.broadcast %9 : vector<1x128xf32> to vector<8x128xf32>
    %11 = arith.subf %7, %10 : vector<8x128xf32>
    %12 = math.exp %11 : vector<8x128xf32>
    %cst_6 = arith.constant dense<0.000000e+00> : vector<128xf32>
    %13 = vector.multi_reduction <add>, %12, %cst_6 [0] : vector<8x128xf32> to vector<128xf32>
    %14 = vector.shape_cast %13 : vector<128xf32> to vector<1x128xf32>
    %15 = math.log %14 : vector<1x128xf32>
    %16 = arith.addf %9, %15 : vector<1x128xf32>
    %c0_7 = arith.constant 0 : index
    %c0_8 = arith.constant 0 : index
    %17 = vector.load %arg4[%c0_7, %c0_8] : memref<1x128xf32, #tpu.memory_space<vmem>>, vector<1x128xf32>
    tpu.vector_store %arg4[%c0_7, %c0_8], %16 {strides = array<i32>} : memref<1x128xf32, #tpu.memory_space<vmem>>, vector<1x128xf32>,
    return
  }
  func.func @transform_0(%arg0: i32) -> (i32, i32) {
    %c0_i32 = arith.constant 0 : i32
    %c0_i32_0 = arith.constant 0 : i32
    %c0_i32_1 = arith.constant 0 : i32
    return %c0_i32, %c0_i32_0 : i32, i32
  }
  func.func @transform_1(%arg0: i32) -> (i32, i32) {
    %c0_i32 = arith.constant 0 : i32
    %c0_i32_0 = arith.constant 0 : i32
    %c0_i32_1 = arith.constant 0 : i32
    return %c0_i32, %c0_i32_0 : i32, i32
  }
  func.func @transform_2(%arg0: i32) -> (i32, i32) {
    %c0_i32 = arith.constant 0 : i32
    %c0_i32_0 = arith.constant 0 : i32
    return %c0_i32, %arg0 : i32, i32
  }
  func.func @transform_3(%arg0: i32) -> (i32, i32) {
    %c0_i32 = arith.constant 0 : i32
    %c0_i32_0 = arith.constant 0 : i32
    return %c0_i32, %arg0 : i32, i32
  }
}

</mosaic_0001>

<bundles_post_ra>
// kernel: tpu_custom_call.1
= control target key start
LH: loop header
LB: loop body
LE: loop exit
PB: predicated region body
PF: predicated region fallthrough
CT: control target
= control target key end

     0   :  { %8 = vsyncpa [#allocation3], 0  ;;  %s276_s0 = inlined_call_operand.vmem [shape: f32[8,64], index: 0, kind: input, shape index: {}]   ;;  %s277_s1 = inlined_call_operand.vmem [shape: f32[8,1], index: 1, kind: input, shape index: {}]   ;;  %s278_s2 = inlined_call_operand.hbm [shape: f32[32,128], index: 2, kind: input, shape index: {}]   ;;  %s279_s3 = inlined_call_operand.hbm [shape: f32[1,128], index: 3, kind: output, shape index: {}]  }
   0x1   :  { %9 = vsyncpa [#allocation4], 0  ;;  %s237_s12 = smov [#allocation2]  }
   0x2   :  { %s19_s13 = sshll.u32 %s237_s12, 4  ;;  %s20_s13 = int_to_ptr.vmem [resolvable:$true] %s19_s13 }
   0x3   :  { %s201_s14 = scalar_lea.vmem %s20_s13, 512  ;;  %p206_p1 = scmp.lt.s32.totalorder %s20_s13, %s20_s13 }
   0x4   :  { %p202_p0 = scmp.ne.s32.totalorder %s20_s13, %s201_s14  ;;  %p207_p2 = scmp.lt.s32.totalorder %s201_s14, %s201_s14 }
   0x6   :  { %p208_p3 = por %p207_p2, %p206_p1 }
   0x8   :  { %p209_p4 = pnand %p208_p3, %p202_p0 }
   0xa   :  { %212 = shalt.err (!%p209_p4)
}
   0xb   :  { %s238_s15 = smov 128   ;;  %s239_s16 = smov 8  }
   0xc   :  { %25 = dma.hbm_to_vmem [thread:$0]  %s278_s2, 512, %s20_s13, [#allocation3], %s238_s15, %s238_s15, %s239_s16  }
   0xd   :  { %233 = dma.done.wait [#allocation3], 512  }
   0xe   :  { %234 = vsyncadd [#allocation3], 4294966784  ;;  %v240_v0 = vmov 0.0   ;;  %vm241_vm0 = vmmov 0   ;;  %v242_v1 = vmov 0   ;;  %v32_v2 = vld [vmem:[#allocation2 + $0x18] sm:$0xff] }
   0xf   :  { %162 = vmatprep.subr.mxu0 %v240_v0  ;;  %178 = vmatprep.mubr.msk.f32.mxu0 %vm241_vm0, %v240_v0  ;;  %v31_v3 = vld [vmem:[#allocation2 + $0x10] sm:$0xff]  ;;  %v38_v4 = vld [vmem:[%s277_s1] sm:$0xff]  ;;  %v30_v5 = vld [vmem:[#allocation2 + $0x8] sm:$0xff]  ;;  %v36_v7 = vmul.f32 %v32_v2, %v32_v2  ;;  %vm44_vm1 = vcmask 523264  }
  0x10   :  { %188 = vset.pattern.permute.xlu0 %v242_v1  ;;  %163 = vmatpush3.msra.mxu0 %v32_v2  ;;  %v29_v6 = vld [vmem:[#allocation2] sm:$0xff]  ;;  %v35_v8 = vmul.f32 %v31_v3, %v31_v3  ;;  %v34_v9 = vmul.f32 %v30_v5, %v30_v5 }
  0x11   :  { %164 = vmatprep.subr.mxu0 %v240_v0  ;;  %41 = vperm.xlu0 %188, %v38_v4   ;;  %v33_v10 = vmul.f32 %v29_v6, %v29_v6  ;;  %v37_v11 = vld [vmem:[%s276_s0] sm:$0xff]  ;;  %s243_s0 = smov [#allocation5]  }
  0x12   :  { %165 = vmatpush3.msra.mxu0 %v31_v3  ;;  %s143_s21 = sshll.u32 %s243_s0, 4  ;;  %s144_s21 = int_to_ptr.vmem [resolvable:$true] %s143_s21 }
  0x13   :  { %166 = vmatprep.subr.mxu0 %v240_v0  ;;  %s213_s22 = scalar_lea.vmem %s144_s21, 16  ;;  %s217_s23 = scalar_lea.vmem %s144_s21, 32 }
  0x14   :  { %167 = vmatpush3.msra.mxu0 %v30_v5  ;;  %p214_p5 = scmp.ne.s32.totalorder %s144_s21, %s213_s22  ;;  %p218_p6 = scmp.lt.s32.totalorder %s144_s21, %s144_s21 }
  0x15   :  { %168 = vmatprep.subr.mxu0 %v240_v0  ;;  %p219_p7 = scmp.lt.s32.totalorder %s217_s23, %s213_s22 }
  0x16   :  { %169 = vmatpush3.msra.mxu0 %v29_v6 }
  0x17   :  { %170 = vmatprep.subr.mxu0 %v240_v0  ;;  %p220_p8 = por %p219_p7, %p218_p6 }
  0x18   :  { %171 = vmatpush3.msra.mxu0 %v36_v7 }
  0x19   :  { %172 = vmatprep.subr.mxu0 %v240_v0  ;;  %p221_p9 = pnand %p220_p8, %p214_p5 }
  0x1a   :  { %173 = vmatpush3.msra.mxu0 %v35_v8 }
  0x1b   :  { %174 = vmatprep.subr.mxu0 %v240_v0 }
  0x1c   :  { %175 = vmatpush3.msra.mxu0 %v34_v9 }
  0x1d   :  { %176 = vmatprep.subr.mxu0 %v240_v0 }
  0x1e   :  { %177 = vmatpush3.msra.mxu0 %v33_v10 }
  0x1f   :  { %179 = vmatmul.mubr.msk.f32.vlgmr.msra.gmra.mxu0 %vm44_vm1, %v37_v11 }
  0x8c   :  { %v42_v12 = vpop.permute.xlu0 %41 }
  0xdf   :  { %v114_v13 = vpop.f32.mrf.mxu0 }
  0xe0   :  { %v115_v14 = vadd.f32 %v114_v13, %v42_v12 }
  0xe1   :  { %v180_v15 = vpop.f32.mrf.mxu0 }
  0xe2   :  { %v118_v16 = vrot.slane %v115_v14, 4 }
  0xe4   :  { %v119_v17 = vmax.f32 %v115_v14, %v118_v16 }
  0xe6   :  { %v120_v18 = vrot.slane %v119_v17, 2 }
  0xe8   :  { %v121_v19 = vmax.f32 %v119_v17, %v120_v18 }
  0xea   :  { %v122_v20 = vrot.slane %v121_v19, 1 }
  0xec   :  { %v123_v21 = vmax.f32 %v121_v19, %v122_v20 }
  0xee   :  { %v124_v22 = vsub.f32 %v115_v14, %v123_v21 }
  0xf0   :  { %v125_v23 = vmul.f32 1.442695, %v124_v22 }
  0xf2   :  { %189 = vpow2.f32 %v125_v23 }
  0xff   :  { %v190_v24 = vpop.eup %189 }
 0x100   :  { %v127_v25 = vrot.slane %v190_v24, 4 }
 0x102   :  { %v128_v26 = vadd.f32 %v190_v24, %v127_v25 }
 0x104   :  { %v129_v27 = vrot.slane %v128_v26, 2 }
 0x106   :  { %v130_v28 = vadd.f32 %v129_v27, %v128_v26 }
 0x108   :  { %v131_v29 = vrot.slane %v130_v28, 1 }
 0x10a   :  { %v132_v30 = vadd.f32 %v131_v29, %v130_v28 }
 0x10c   :  { %191 = vlog2.f32 %v132_v30 }
 0x119   :  { %v192_v31 = vpop.eup %191 }
 0x11a   :  { %v134_v32 = vmul.f32 0.6931472, %v192_v31 }
 0x11c   :  { %v135_v33 = vadd.f32 %v134_v32, %v123_v21 }
 0x11e   :  { %136 = vst [vmem:[#allocation5] sm:$0x1] %v135_v33 }
 0x11f   :  { %224 = shalt.err (!%p221_p9)
}
 0x120   :  { %146 = dma.vmem_to_hbm [thread:$0]  %s144_s21, 16, %s279_s3, [#allocation4]  }
 0x121   :  { %235 = dma.done.wait [#allocation4], 16  }
 0x122   :  { %236 = vsyncadd [#allocation4], 4294967280 }
 0x123   :  { %150 = vsyncpa [#allocation3], 1 }
 0x124   :  { %151 = vsyncpa [#allocation4], 1 }

</bundles_post_ra>
